<compile_context>
chip_gen: v6e
topology: v6e:2x2x1
jax: 0.10.0
libtpu: 0.0.40
codegen_flags: <defaults>
</compile_context>

<pallas_src>
import functools
import numpy as np
import jax
import jax.numpy as jnp
from jax import lax
from jax.experimental import pallas as pl
from jax.experimental.pallas import tpu as pltpu

_EPS = 1e-10
_NLANE = 128          # lane-dense partial-sum slots per program
_TILE = 2048          # pair-dimension tile for large M


def _round_up(x, m):
    return ((x + m - 1) // m) * m


def _logsig(x):
    # Matches torch: log(sigmoid(x) + 1e-10), sigmoid evaluated stably.
    e = jnp.exp(-jnp.abs(x))
    sig = jnp.where(x >= 0, 1.0 / (1.0 + e), e / (1.0 + e))
    return jnp.log(sig + _EPS)


# ---------------------------------------------------------------------------
# Fused kernel: in-kernel gather + BPR partial sums + Gram-based score stats.
# One grid step processes a (tm, 4) tile of packed (user, item_p, item_n,
# mask) rows; the packed embedding tables / Gram / column-sums stay
# VMEM-resident across steps.
# ---------------------------------------------------------------------------
def _dice_fused_kernel(pairs_ref, utab_ref, itab_ref, g_ref, cs_ref, out_ref,
                       *, m_total, emb):
    tm = pairs_ref.shape[0]
    nu = utab_ref.shape[0]
    ni = itab_ref.shape[0]

    pairs = pairs_ref[...]                        # (tm, 4) int32 [u, p, n, mask]
    u_idx = pairs[:, 0:1]
    p_idx = pairs[:, 1:2]
    n_idx = pairs[:, 2:3]
    mask = pairs[:, 3:4].astype(jnp.float32)      # (tm, 1)

    # ---- fused gather: one-hot @ packed [int|pop] tables on the MXU --------
    # Padded rows carry index -1 -> all-zero one-hot row -> all-zero embedding.
    iota_u = lax.broadcasted_iota(jnp.int32, (tm, nu), 1)
    oh_u = (iota_u == u_idx).astype(jnp.float32)
    x = jnp.dot(oh_u, utab_ref[...],
                preferred_element_type=jnp.float32)           # (tm, 2E) user [int|pop]

    iota_i = lax.broadcasted_iota(jnp.int32, (tm, ni), 1)
    oh_d = ((iota_i == p_idx).astype(jnp.float32)
            - (iota_i == n_idx).astype(jnp.float32))
    d = jnp.dot(oh_d, itab_ref[...],
                preferred_element_type=jnp.float32)           # (tm, 2E) pos-neg diff

    # ---- pairwise BPR: one packed 64-lane product, split lane reductions ----
    prod = x * d                                              # (tm, 2E)
    d_int = jnp.sum(prod[:, :emb], axis=1, keepdims=True)     # (tm, 1)
    d_pop = jnp.sum(prod[:, emb:], axis=1, keepdims=True)     # (tm, 1)

    row_g = pl.program_id(0) * tm + lax.broadcasted_iota(jnp.int32, (tm, 1), 0)
    valid = (row_g < m_total).astype(jnp.float32)             # in-kernel validity
    vm = valid * mask
    s_int = jnp.sum(vm * _logsig(d_int))
    s_pop = jnp.sum(vm * _logsig(-d_pop) + (valid - vm) * _logsig(d_pop))
    s_tot = jnp.sum(valid * _logsig(d_int + d_pop))

    # ---- KL score statistics via hoisted item Gram / column-sums -----------
    cs_items = cs_ref[0:1, :]                                 # (1, 2E) [int|pop]
    cs_x = jnp.sum(x, axis=0, keepdims=True)                  # (1, 2E)
    lin = cs_x * cs_items
    sum_sc_int = jnp.sum(lin[:, :emb])
    sum_sc_pop = jnp.sum(lin[:, emb:])

    xg = jnp.dot(x, g_ref[...],
                 preferred_element_type=jnp.float32)          # (tm, 2E), block-diag Gram
    q = jnp.sum(xg * x, axis=0, keepdims=True)                # (1, 2E)
    sq_sc_int = jnp.sum(q[:, :emb])
    sq_sc_pop = jnp.sum(q[:, emb:])

    # ---- one lane-dense (8, 128) partial tile per program -------------------
    # ~20 VPU ops on a single vreg: free filler under the MXU/DMA work above.
    vals = (s_int, s_pop, s_tot, sum_sc_int, sq_sc_int, sum_sc_pop, sq_sc_pop)
    lane_o = lax.broadcasted_iota(jnp.int32, (8, _NLANE), 1)
    sub_o = lax.broadcasted_iota(jnp.int32, (8, _NLANE), 0)
    row = jnp.zeros((8, _NLANE), jnp.float32)
    for k, val in enumerate(vals):
        row = row + jnp.where((sub_o == 0) & (lane_o == k), val, 0.0)
    out_ref[...] = row


def init_params(key, num_users, num_items, embedding_size):
    # nn.Embedding default init: N(0, 1)
    k1, k2, k3, k4 = jax.random.split(key, 4)
    return dict(
        users_int=jax.random.normal(k1, (num_users, embedding_size), jnp.float32),
        users_pop=jax.random.normal(k2, (num_users, embedding_size), jnp.float32),
        items_int=jax.random.normal(k3, (num_items, embedding_size), jnp.float32),
        items_pop=jax.random.normal(k4, (num_items, embedding_size), jnp.float32),
    )


def dice_forward(params, user, item_p, item_n, mask, item_all, user_all,
                 int_weight, pop_weight, kl_weight, dis_pen):
    B, N = user.shape
    M = B * N
    E = params['users_int'].shape[1]
    num_users = params['users_int'].shape[0]
    num_items = params['items_int'].shape[0]

    # --- tiling of the flattened pair dimension ------------------------------
    if M >= 2 * _TILE:
        tm = _TILE
    else:
        # small inputs: split into two tiles so both v7x TensorCores get work
        tm = max(8, _round_up((M + 1) // 2, 8))
    grid = pl.cdiv(M, tm)
    m_pad = grid * tm
    pad = m_pad - M

    # --- packed per-pair int32 stream: [user, item_p, item_n, mask] ----------
    pairs = jnp.stack(
        [user.reshape(-1), item_p.reshape(-1), item_n.reshape(-1),
         mask.reshape(-1).astype(jnp.int32)], axis=1).astype(jnp.int32)
    if pad:
        pad_rows = jnp.full((pad, 4), -1, jnp.int32).at[:, 3].set(0)
        pairs = jnp.concatenate([pairs, pad_rows], axis=0)

    # --- packed resident tables: [int | pop] along the lane axis -------------
    # TODO(synk): budget against v7x's 32 MiB scoped / 64 MiB physical VMEM and
    # fall back to a DMA-gather path when the tables do not fit.
    nu_pad = _round_up(num_users, 8)
    ni_pad = _round_up(num_items, 8)
    utab = jnp.concatenate([params['users_int'], params['users_pop']], axis=1)
    itab = jnp.concatenate([params['items_int'], params['items_pop']], axis=1)
    utab = jnp.pad(utab, ((0, nu_pad - num_users), (0, 0)))
    itab = jnp.pad(itab, ((0, ni_pad - num_items), (0, 0)))

    # --- grid-invariant statistics hoisted out of the kernel (tiny XLA ops) --
    iti = params['items_int'][item_all]            # (Ui, E)
    itp = params['items_pop'][item_all]
    usi = params['users_int'][user_all]            # (Uu, E)
    usp = params['users_pop'][user_all]
    g_int = jnp.dot(iti.T, iti, preferred_element_type=jnp.float32)   # (E, E)
    g_pop = jnp.dot(itp.T, itp, preferred_element_type=jnp.float32)
    gram = jnp.zeros((2 * E, 2 * E), jnp.float32)
    gram = gram.at[:E, :E].set(g_int).at[E:, E:].set(g_pop)           # block-diag
    cs = jnp.zeros((8, 2 * E), jnp.float32)
    cs = cs.at[0, :].set(jnp.concatenate([jnp.sum(iti, axis=0),
                                          jnp.sum(itp, axis=0)]))
    discrepancy_loss = (jnp.mean((iti - itp) ** 2)
                        + jnp.mean((usi - usp) ** 2))

    kernel = functools.partial(_dice_fused_kernel, m_total=M, emb=E)

    partials = pl.pallas_call(
        kernel,
        out_shape=jax.ShapeDtypeStruct((grid * 8, _NLANE), jnp.float32),
        grid=(grid,),
        in_specs=[
            pl.BlockSpec((tm, 4), lambda i: (i, 0)),            # pair stream
            pl.BlockSpec((nu_pad, 2 * E), lambda i: (0, 0)),    # resident user table
            pl.BlockSpec((ni_pad, 2 * E), lambda i: (0, 0)),    # resident item table
            pl.BlockSpec((2 * E, 2 * E), lambda i: (0, 0)),     # block-diag Gram
            pl.BlockSpec((8, 2 * E), lambda i: (0, 0)),         # item column-sums
        ],
        out_specs=pl.BlockSpec((8, _NLANE), lambda i: (i, 0)),
        compiler_params=pltpu.CompilerParams(
            dimension_semantics=("parallel",)),
    )(pairs, utab, itab, gram, cs)

    # --- tiny scalar epilogue -------------------------------------------------
    sums = jnp.sum(partials, axis=0)               # cross-program reduction, (128,)
    s_int, s_pop, s_tot = sums[0], sums[1], sums[2]
    sum_i, sq_i, sum_p, sq_p = sums[3], sums[4], sums[5], sums[6]

    f_m = float(M)
    loss_int = -s_int / f_m
    loss_pop = -s_pop / f_m
    loss_total = -s_tot / f_m

    n_scores = f_m * float(item_all.shape[0])

    def kl_from_stats(s, sq):
        # KL( N(mean, std_unbiased) || N(0,1) ), std with (n-1) like torch.std.
        mean = s / n_scores
        var = (sq - n_scores * mean * mean) / max(n_scores - 1.0, 1.0)
        var = jnp.maximum(var, 1e-12)              # guard f32 cancellation -> NaN
        return 0.5 * (var + mean * mean - 1.0) - 0.5 * jnp.log(var)

    kl_loss_int = kl_from_stats(sum_i, sq_i)
    kl_loss_pop = kl_from_stats(sum_p, sq_p)

    return (int_weight * loss_int + pop_weight * loss_pop + loss_total
            - dis_pen * discrepancy_loss
            + kl_weight * (kl_loss_int + kl_loss_pop))


if __name__ == "__main__":
    num_users, num_items, embedding_size = 50, 80, 32
    B, N = 2, 8                      # user/item_p/item_n/mask are (B, N)
    int_weight, pop_weight, kl_weight, dis_pen = 0.1, 0.1, 0.01, 0.01

    key = jax.random.PRNGKey(0)
    pkey, k_u, k_p, k_n, k_m = jax.random.split(key, 5)
    params = init_params(pkey, num_users, num_items, embedding_size)

    user = jax.random.randint(k_u, (B, N), 0, num_users, dtype=jnp.int32)
    item_p = jax.random.randint(k_p, (B, N), 0, num_items, dtype=jnp.int32)
    item_n = jax.random.randint(k_n, (B, N), 0, num_items, dtype=jnp.int32)
    mask = jax.random.bernoulli(k_m, 0.5, (B, N))

    # torch.unique has a data-dependent output shape; computed host-side
    # (sorted unique values, matching torch.unique semantics).
    item_all = jnp.asarray(
        np.unique(np.concatenate([np.asarray(item_p).ravel(),
                                  np.asarray(item_n).ravel()])), dtype=jnp.int32)
    user_all = jnp.asarray(np.unique(np.asarray(user).ravel()), dtype=jnp.int32)

    loss_fn = jax.jit(dice_forward)
    loss = loss_fn(params, user, item_p, item_n, mask, item_all, user_all,
                   int_weight, pop_weight, kl_weight, dis_pen)
    jax.block_until_ready(loss)
    assert bool(jnp.isfinite(loss))
    print("KERNEL_OK")
</pallas_src>

<mosaic_0001>
module attributes {stable_mosaic.version = 11 : i64} {
  func.func @_dice_fused_kernel(%arg0: i32, %arg1: memref<8x4xi32, #tpu.memory_space<vmem>>, %arg2: memref<56x64xf32, #tpu.memory_space<vmem>>, %arg3: memref<80x64xf32, #tpu.memory_space<vmem>>, %arg4: memref<64x64xf32, #tpu.memory_space<vmem>>, %arg5: memref<8x64xf32, #tpu.memory_space<vmem>>, %arg6: memref<8x128xf32, #tpu.memory_space<vmem>>) attributes {dimension_semantics = [#tpu.dimension_semantics<parallel>], iteration_bounds = array<i64: 2>, scalar_prefetch = 0 : i64, scratch_operands = 0 : i64, tpu.core_type = #tpu.core_type<tc>, window_params = [{transform_indices = @transform_0, window_bounds = array<i64: 8, 4>}, {pipeline_mode = #tpu.pipeline_mode<synchronous>, transform_indices = @transform_1, window_bounds = array<i64: 56, 64>}, {pipeline_mode = #tpu.pipeline_mode<synchronous>, transform_indices = @transform_2, window_bounds = array<i64: 80, 64>}, {pipeline_mode = #tpu.pipeline_mode<synchronous>, transform_indices = @transform_3, window_bounds = array<i64: 64, 64>}, {pipeline_mode = #tpu.pipeline_mode<synchronous>, transform_indices = @transform_4, window_bounds = array<i64: 8, 64>}, {transform_indices = @transform_5, window_bounds = array<i64: 8, 128>}]} {
    %c0 = arith.constant 0 : index
    %c0_0 = arith.constant 0 : index
    %0 = vector.load %arg1[%c0, %c0_0] : memref<8x4xi32, #tpu.memory_space<vmem>>, vector<8x4xi32>
    %1 = vector.extract_strided_slice %0 {offsets = [0, 0], sizes = [8, 1], strides = [1, 1]} : vector<8x4xi32> to vector<8x1xi32>
    %2 = vector.extract_strided_slice %0 {offsets = [0, 1], sizes = [8, 1], strides = [1, 1]} : vector<8x4xi32> to vector<8x1xi32>
    %3 = vector.extract_strided_slice %0 {offsets = [0, 2], sizes = [8, 1], strides = [1, 1]} : vector<8x4xi32> to vector<8x1xi32>
    %4 = vector.extract_strided_slice %0 {offsets = [0, 3], sizes = [8, 1], strides = [1, 1]} : vector<8x4xi32> to vector<8x1xi32>
    %5 = arith.sitofp %4 : vector<8x1xi32> to vector<8x1xf32>
    %6 = tpu.iota {dimensions = array<i32: 1>} : vector<8x56xi32>
    %7 = vector.broadcast %1 : vector<8x1xi32> to vector<8x56xi32>
    %8 = arith.cmpi eq, %6, %7 : vector<8x56xi32>
    %9 = arith.extui %8 : vector<8x56xi1> to vector<8x56xi32>
    %10 = arith.sitofp %9 : vector<8x56xi32> to vector<8x56xf32>
    %c0_1 = arith.constant 0 : index
    %c0_2 = arith.constant 0 : index
    %11 = vector.load %arg2[%c0_1, %c0_2] : memref<56x64xf32, #tpu.memory_space<vmem>>, vector<56x64xf32>
    %cst = arith.constant dense<0.000000e+00> : vector<8x64xf32>
    %12 = tpu.matmul %10, %11, %cst {dimension_numbers = #tpu.dot_dimension_numbers<[1], [0], [0], [1], [0, 0, 1, 1], [], []>} : vector<8x56xf32>, vector<56x64xf32>, vector<8x64xf32> -> vector<8x64xf32>
    %13 = tpu.iota {dimensions = array<i32: 1>} : vector<8x80xi32>
    %14 = vector.broadcast %2 : vector<8x1xi32> to vector<8x80xi32>
    %15 = arith.cmpi eq, %13, %14 : vector<8x80xi32>
    %16 = arith.extui %15 : vector<8x80xi1> to vector<8x80xi32>
    %17 = arith.sitofp %16 : vector<8x80xi32> to vector<8x80xf32>
    %18 = vector.broadcast %3 : vector<8x1xi32> to vector<8x80xi32>
    %19 = arith.cmpi eq, %13, %18 : vector<8x80xi32>
    %20 = arith.extui %19 : vector<8x80xi1> to vector<8x80xi32>
    %21 = arith.sitofp %20 : vector<8x80xi32> to vector<8x80xf32>
    %22 = arith.subf %17, %21 : vector<8x80xf32>
    %c0_3 = arith.constant 0 : index
    %c0_4 = arith.constant 0 : index
    %23 = vector.load %arg3[%c0_3, %c0_4] : memref<80x64xf32, #tpu.memory_space<vmem>>, vector<80x64xf32>
    %cst_5 = arith.constant dense<0.000000e+00> : vector<8x64xf32>
    %24 = tpu.matmul %22, %23, %cst_5 {dimension_numbers = #tpu.dot_dimension_numbers<[1], [0], [0], [1], [0, 0, 1, 1], [], []>} : vector<8x80xf32>, vector<80x64xf32>, vector<8x64xf32> -> vector<8x64xf32>
    %25 = arith.mulf %12, %24 : vector<8x64xf32>
    %26 = vector.extract_strided_slice %25 {offsets = [0, 0], sizes = [8, 32], strides = [1, 1]} : vector<8x64xf32> to vector<8x32xf32>
    %cst_6 = arith.constant dense<0.000000e+00> : vector<8xf32>
    %27 = vector.multi_reduction <add>, %26, %cst_6 [1] : vector<8x32xf32> to vector<8xf32>
    %28 = vector.shape_cast %27 : vector<8xf32> to vector<8x1xf32>
    %29 = vector.extract_strided_slice %25 {offsets = [0, 32], sizes = [8, 32], strides = [1, 1]} : vector<8x64xf32> to vector<8x32xf32>
    %cst_7 = arith.constant dense<0.000000e+00> : vector<8xf32>
    %30 = vector.multi_reduction <add>, %29, %cst_7 [1] : vector<8x32xf32> to vector<8xf32>
    %31 = vector.shape_cast %30 : vector<8xf32> to vector<8x1xf32>
    %c8_i32 = arith.constant 8 : i32
    %32 = arith.muli %arg0, %c8_i32 : i32
    %33 = tpu.iota {dimensions = array<i32: 0>} : vector<8x1xi32>
    %34 = vector.broadcast %32 : i32 to vector<8x1xi32>
    %35 = arith.addi %34, %33 : vector<8x1xi32>
    %c16_i32 = arith.constant 16 : i32
    %36 = vector.broadcast %c16_i32 : i32 to vector<8x1xi32>
    %37 = arith.cmpi slt, %35, %36 : vector<8x1xi32>
    %38 = arith.extui %37 : vector<8x1xi1> to vector<8x1xi32>
    %39 = arith.sitofp %38 : vector<8x1xi32> to vector<8x1xf32>
    %40 = arith.mulf %39, %5 : vector<8x1xf32>
    %41 = math.absf %28 : vector<8x1xf32>
    %cst_8 = arith.constant 0.000000e+00 : f32
    %42 = vector.broadcast %cst_8 : f32 to vector<8x1xf32>
    %43 = arith.subf %42, %41 : vector<8x1xf32>
    %44 = math.exp %43 : vector<8x1xf32>
    %cst_9 = arith.constant 0.000000e+00 : f32
    %45 = vector.broadcast %cst_9 : f32 to vector<8x1xf32>
    %46 = arith.cmpf oge, %28, %45 : vector<8x1xf32>
    %cst_10 = arith.constant 1.000000e+00 : f32
    %47 = vector.broadcast %cst_10 : f32 to vector<8x1xf32>
    %48 = arith.addf %47, %44 : vector<8x1xf32>
    %cst_11 = arith.constant 1.000000e+00 : f32
    %49 = vector.broadcast %cst_11 : f32 to vector<8x1xf32>
    %50 = arith.divf %49, %48 : vector<8x1xf32>
    %cst_12 = arith.constant 1.000000e+00 : f32
    %51 = vector.broadcast %cst_12 : f32 to vector<8x1xf32>
    %52 = arith.addf %51, %44 : vector<8x1xf32>
    %53 = arith.divf %44, %52 : vector<8x1xf32>
    %54 = arith.select %46, %50, %53 : vector<8x1xi1>, vector<8x1xf32>
    %cst_13 = arith.constant 1.000000e-10 : f32
    %55 = vector.broadcast %cst_13 : f32 to vector<8x1xf32>
    %56 = arith.addf %54, %55 : vector<8x1xf32>
    %57 = math.log %56 : vector<8x1xf32>
    %58 = arith.mulf %40, %57 : vector<8x1xf32>
    %59 = vector.shape_cast %58 : vector<8x1xf32> to vector<1x8x1xf32>
    %cst_14 = arith.constant dense<0.000000e+00> : vector<1xf32>
    %60 = vector.multi_reduction <add>, %59, %cst_14 [1, 2] : vector<1x8x1xf32> to vector<1xf32>
    %61 = vector.shape_cast %60 : vector<1xf32> to vector<1x1x1xf32>
    %62 = vector.extract %61[0, 0, 0] : f32 from vector<1x1x1xf32>
    %cst_15 = arith.constant 0.000000e+00 : f32
    %63 = vector.broadcast %cst_15 : f32 to vector<8x1xf32>
    %64 = arith.subf %63, %31 : vector<8x1xf32>
    %65 = math.absf %64 : vector<8x1xf32>
    %cst_16 = arith.constant 0.000000e+00 : f32
    %66 = vector.broadcast %cst_16 : f32 to vector<8x1xf32>
    %67 = arith.subf %66, %65 : vector<8x1xf32>
    %68 = math.exp %67 : vector<8x1xf32>
    %cst_17 = arith.constant 0.000000e+00 : f32
    %69 = vector.broadcast %cst_17 : f32 to vector<8x1xf32>
    %70 = arith.cmpf oge, %64, %69 : vector<8x1xf32>
    %cst_18 = arith.constant 1.000000e+00 : f32
    %71 = vector.broadcast %cst_18 : f32 to vector<8x1xf32>
    %72 = arith.addf %71, %68 : vector<8x1xf32>
    %cst_19 = arith.constant 1.000000e+00 : f32
    %73 = vector.broadcast %cst_19 : f32 to vector<8x1xf32>
    %74 = arith.divf %73, %72 : vector<8x1xf32>
    %cst_20 = arith.constant 1.000000e+00 : f32
    %75 = vector.broadcast %cst_20 : f32 to vector<8x1xf32>
    %76 = arith.addf %75, %68 : vector<8x1xf32>
    %77 = arith.divf %68, %76 : vector<8x1xf32>
    %78 = arith.select %70, %74, %77 : vector<8x1xi1>, vector<8x1xf32>
    %cst_21 = arith.constant 1.000000e-10 : f32
    %79 = vector.broadcast %cst_21 : f32 to vector<8x1xf32>
    %80 = arith.addf %78, %79 : vector<8x1xf32>
    %81 = math.log %80 : vector<8x1xf32>
    %82 = arith.mulf %40, %81 : vector<8x1xf32>
    %83 = arith.subf %39, %40 : vector<8x1xf32>
    %84 = math.absf %31 : vector<8x1xf32>
    %cst_22 = arith.constant 0.000000e+00 : f32
    %85 = vector.broadcast %cst_22 : f32 to vector<8x1xf32>
    %86 = arith.subf %85, %84 : vector<8x1xf32>
    %87 = math.exp %86 : vector<8x1xf32>
    %cst_23 = arith.constant 0.000000e+00 : f32
    %88 = vector.broadcast %cst_23 : f32 to vector<8x1xf32>
    %89 = arith.cmpf oge, %31, %88 : vector<8x1xf32>
    %cst_24 = arith.constant 1.000000e+00 : f32
    %90 = vector.broadcast %cst_24 : f32 to vector<8x1xf32>
    %91 = arith.addf %90, %87 : vector<8x1xf32>
    %cst_25 = arith.constant 1.000000e+00 : f32
    %92 = vector.broadcast %cst_25 : f32 to vector<8x1xf32>
    %93 = arith.divf %92, %91 : vector<8x1xf32>
    %cst_26 = arith.constant 1.000000e+00 : f32
    %94 = vector.broadcast %cst_26 : f32 to vector<8x1xf32>
    %95 = arith.addf %94, %87 : vector<8x1xf32>
    %96 = arith.divf %87, %95 : vector<8x1xf32>
    %97 = arith.select %89, %93, %96 : vector<8x1xi1>, vector<8x1xf32>
    %cst_27 = arith.constant 1.000000e-10 : f32
    %98 = vector.broadcast %cst_27 : f32 to vector<8x1xf32>
    %99 = arith.addf %97, %98 : vector<8x1xf32>
    %100 = math.log %99 : vector<8x1xf32>
    %101 = arith.mulf %83, %100 : vector<8x1xf32>
    %102 = arith.addf %82, %101 : vector<8x1xf32>
    %103 = vector.shape_cast %102 : vector<8x1xf32> to vector<1x8x1xf32>
    %cst_28 = arith.constant dense<0.000000e+00> : vector<1xf32>
    %104 = vector.multi_reduction <add>, %103, %cst_28 [1, 2] : vector<1x8x1xf32> to vector<1xf32>
    %105 = vector.shape_cast %104 : vector<1xf32> to vector<1x1x1xf32>
    %106 = vector.extract %105[0, 0, 0] : f32 from vector<1x1x1xf32>
    %107 = arith.addf %28, %31 : vector<8x1xf32>
    %108 = math.absf %107 : vector<8x1xf32>
    %cst_29 = arith.constant 0.000000e+00 : f32
    %109 = vector.broadcast %cst_29 : f32 to vector<8x1xf32>
    %110 = arith.subf %109, %108 : vector<8x1xf32>
    %111 = math.exp %110 : vector<8x1xf32>
    %cst_30 = arith.constant 0.000000e+00 : f32
    %112 = vector.broadcast %cst_30 : f32 to vector<8x1xf32>
    %113 = arith.cmpf oge, %107, %112 : vector<8x1xf32>
    %cst_31 = arith.constant 1.000000e+00 : f32
    %114 = vector.broadcast %cst_31 : f32 to vector<8x1xf32>
    %115 = arith.addf %114, %111 : vector<8x1xf32>
    %cst_32 = arith.constant 1.000000e+00 : f32
    %116 = vector.broadcast %cst_32 : f32 to vector<8x1xf32>
    %117 = arith.divf %116, %115 : vector<8x1xf32>
    %cst_33 = arith.constant 1.000000e+00 : f32
    %118 = vector.broadcast %cst_33 : f32 to vector<8x1xf32>
    %119 = arith.addf %118, %111 : vector<8x1xf32>
    %120 = arith.divf %111, %119 : vector<8x1xf32>
    %121 = arith.select %113, %117, %120 : vector<8x1xi1>, vector<8x1xf32>
    %cst_34 = arith.constant 1.000000e-10 : f32
    %122 = vector.broadcast %cst_34 : f32 to vector<8x1xf32>
    %123 = arith.addf %121, %122 : vector<8x1xf32>
    %124 = math.log %123 : vector<8x1xf32>
    %125 = arith.mulf %39, %124 : vector<8x1xf32>
    %126 = vector.shape_cast %125 : vector<8x1xf32> to vector<1x8x1xf32>
    %cst_35 = arith.constant dense<0.000000e+00> : vector<1xf32>
    %127 = vector.multi_reduction <add>, %126, %cst_35 [1, 2] : vector<1x8x1xf32> to vector<1xf32>
    %128 = vector.shape_cast %127 : vector<1xf32> to vector<1x1x1xf32>
    %129 = vector.extract %128[0, 0, 0] : f32 from vector<1x1x1xf32>
    %c0_36 = arith.constant 0 : index
    %c0_37 = arith.constant 0 : index
    %130 = vector.load %arg5[%c0_36, %c0_37] : memref<8x64xf32, #tpu.memory_space<vmem>>, vector<1x64xf32>
    %cst_38 = arith.constant dense<0.000000e+00> : vector<64xf32>
    %131 = vector.multi_reduction <add>, %12, %cst_38 [0] : vector<8x64xf32> to vector<64xf32>
    %132 = vector.shape_cast %131 : vector<64xf32> to vector<1x64xf32>
    %133 = arith.mulf %132, %130 : vector<1x64xf32>
    %134 = vector.extract_strided_slice %133 {offsets = [0, 0], sizes = [1, 32], strides = [1, 1]} : vector<1x64xf32> to vector<1x32xf32>
    %135 = vector.shape_cast %134 : vector<1x32xf32> to vector<1x1x32xf32>
    %cst_39 = arith.constant dense<0.000000e+00> : vector<1xf32>
    %136 = vector.multi_reduction <add>, %135, %cst_39 [1, 2] : vector<1x1x32xf32> to vector<1xf32>
    %137 = vector.shape_cast %136 : vector<1xf32> to vector<1x1x1xf32>
    %138 = vector.extract %137[0, 0, 0] : f32 from vector<1x1x1xf32>
    %139 = vector.extract_strided_slice %133 {offsets = [0, 32], sizes = [1, 32], strides = [1, 1]} : vector<1x64xf32> to vector<1x32xf32>
    %140 = vector.shape_cast %139 : vector<1x32xf32> to vector<1x1x32xf32>
    %cst_40 = arith.constant dense<0.000000e+00> : vector<1xf32>
    %141 = vector.multi_reduction <add>, %140, %cst_40 [1, 2] : vector<1x1x32xf32> to vector<1xf32>
    %142 = vector.shape_cast %141 : vector<1xf32> to vector<1x1x1xf32>
    %143 = vector.extract %142[0, 0, 0] : f32 from vector<1x1x1xf32>
    %c0_41 = arith.constant 0 : index
    %c0_42 = arith.constant 0 : index
    %144 = vector.load %arg4[%c0_41, %c0_42] : memref<64x64xf32, #tpu.memory_space<vmem>>, vector<64x64xf32>
    %cst_43 = arith.constant dense<0.000000e+00> : vector<8x64xf32>
    %145 = tpu.matmul %12, %144, %cst_43 {dimension_numbers = #tpu.dot_dimension_numbers<[1], [0], [0], [1], [0, 0, 1, 1], [], []>} : vector<8x64xf32>, vector<64x64xf32>, vector<8x64xf32> -> vector<8x64xf32>
    %146 = arith.mulf %145, %12 : vector<8x64xf32>
    %cst_44 = arith.constant dense<0.000000e+00> : vector<64xf32>
    %147 = vector.multi_reduction <add>, %146, %cst_44 [0] : vector<8x64xf32> to vector<64xf32>
    %148 = vector.shape_cast %147 : vector<64xf32> to vector<1x64xf32>
    %149 = vector.extract_strided_slice %148 {offsets = [0, 0], sizes = [1, 32], strides = [1, 1]} : vector<1x64xf32> to vector<1x32xf32>
    %150 = vector.shape_cast %149 : vector<1x32xf32> to vector<1x1x32xf32>
    %cst_45 = arith.constant dense<0.000000e+00> : vector<1xf32>
    %151 = vector.multi_reduction <add>, %150, %cst_45 [1, 2] : vector<1x1x32xf32> to vector<1xf32>
    %152 = vector.shape_cast %151 : vector<1xf32> to vector<1x1x1xf32>
    %153 = vector.extract %152[0, 0, 0] : f32 from vector<1x1x1xf32>
    %154 = vector.extract_strided_slice %148 {offsets = [0, 32], sizes = [1, 32], strides = [1, 1]} : vector<1x64xf32> to vector<1x32xf32>
    %155 = vector.shape_cast %154 : vector<1x32xf32> to vector<1x1x32xf32>
    %cst_46 = arith.constant dense<0.000000e+00> : vector<1xf32>
    %156 = vector.multi_reduction <add>, %155, %cst_46 [1, 2] : vector<1x1x32xf32> to vector<1xf32>
    %157 = vector.shape_cast %156 : vector<1xf32> to vector<1x1x1xf32>
    %158 = vector.extract %157[0, 0, 0] : f32 from vector<1x1x1xf32>
    %159 = tpu.iota {dimensions = array<i32: 1>} : vector<8x128xi32>
    %160 = tpu.iota {dimensions = array<i32: 0>} : vector<8x128xi32>
    %cst_47 = arith.constant 0.000000e+00 : f32
    %161 = vector.broadcast %cst_47 : f32 to vector<8x128xf32>
    %c0_i32 = arith.constant 0 : i32
    %162 = vector.broadcast %c0_i32 : i32 to vector<8x128xi32>
    %163 = arith.cmpi eq, %160, %162 : vector<8x128xi32>
    %c0_i32_48 = arith.constant 0 : i32
    %164 = vector.broadcast %c0_i32_48 : i32 to vector<8x128xi32>
    %165 = arith.cmpi eq, %159, %164 : vector<8x128xi32>
    %166 = arith.andi %163, %165 : vector<8x128xi1>
    %cst_49 = arith.constant 0.000000e+00 : f32
    %167 = vector.broadcast %62 : f32 to vector<8x128xf32>
    %168 = vector.broadcast %cst_49 : f32 to vector<8x128xf32>
    %169 = arith.select %166, %167, %168 : vector<8x128xi1>, vector<8x128xf32>
    %170 = arith.addf %161, %169 : vector<8x128xf32>
    %c0_i32_50 = arith.constant 0 : i32
    %171 = vector.broadcast %c0_i32_50 : i32 to vector<8x128xi32>
    %172 = arith.cmpi eq, %160, %171 : vector<8x128xi32>
    %c1_i32 = arith.constant 1 : i32
    %173 = vector.broadcast %c1_i32 : i32 to vector<8x128xi32>
    %174 = arith.cmpi eq, %159, %173 : vector<8x128xi32>
    %175 = arith.andi %172, %174 : vector<8x128xi1>
    %cst_51 = arith.constant 0.000000e+00 : f32
    %176 = vector.broadcast %106 : f32 to vector<8x128xf32>
    %177 = vector.broadcast %cst_51 : f32 to vector<8x128xf32>
    %178 = arith.select %175, %176, %177 : vector<8x128xi1>, vector<8x128xf32>
    %179 = arith.addf %170, %178 : vector<8x128xf32>
    %c0_i32_52 = arith.constant 0 : i32
    %180 = vector.broadcast %c0_i32_52 : i32 to vector<8x128xi32>
    %181 = arith.cmpi eq, %160, %180 : vector<8x128xi32>
    %c2_i32 = arith.constant 2 : i32
    %182 = vector.broadcast %c2_i32 : i32 to vector<8x128xi32>
    %183 = arith.cmpi eq, %159, %182 : vector<8x128xi32>
    %184 = arith.andi %181, %183 : vector<8x128xi1>
    %cst_53 = arith.constant 0.000000e+00 : f32
    %185 = vector.broadcast %129 : f32 to vector<8x128xf32>
    %186 = vector.broadcast %cst_53 : f32 to vector<8x128xf32>
    %187 = arith.select %184, %185, %186 : vector<8x128xi1>, vector<8x128xf32>
    %188 = arith.addf %179, %187 : vector<8x128xf32>
    %c0_i32_54 = arith.constant 0 : i32
    %189 = vector.broadcast %c0_i32_54 : i32 to vector<8x128xi32>
    %190 = arith.cmpi eq, %160, %189 : vector<8x128xi32>
    %c3_i32 = arith.constant 3 : i32
    %191 = vector.broadcast %c3_i32 : i32 to vector<8x128xi32>
    %192 = arith.cmpi eq, %159, %191 : vector<8x128xi32>
    %193 = arith.andi %190, %192 : vector<8x128xi1>
    %cst_55 = arith.constant 0.000000e+00 : f32
    %194 = vector.broadcast %138 : f32 to vector<8x128xf32>
    %195 = vector.broadcast %cst_55 : f32 to vector<8x128xf32>
    %196 = arith.select %193, %194, %195 : vector<8x128xi1>, vector<8x128xf32>
    %197 = arith.addf %188, %196 : vector<8x128xf32>
    %c0_i32_56 = arith.constant 0 : i32
    %198 = vector.broadcast %c0_i32_56 : i32 to vector<8x128xi32>
    %199 = arith.cmpi eq, %160, %198 : vector<8x128xi32>
    %c4_i32 = arith.constant 4 : i32
    %200 = vector.broadcast %c4_i32 : i32 to vector<8x128xi32>
    %201 = arith.cmpi eq, %159, %200 : vector<8x128xi32>
    %202 = arith.andi %199, %201 : vector<8x128xi1>
    %cst_57 = arith.constant 0.000000e+00 : f32
    %203 = vector.broadcast %153 : f32 to vector<8x128xf32>
    %204 = vector.broadcast %cst_57 : f32 to vector<8x128xf32>
    %205 = arith.select %202, %203, %204 : vector<8x128xi1>, vector<8x128xf32>
    %206 = arith.addf %197, %205 : vector<8x128xf32>
    %c0_i32_58 = arith.constant 0 : i32
    %207 = vector.broadcast %c0_i32_58 : i32 to vector<8x128xi32>
    %208 = arith.cmpi eq, %160, %207 : vector<8x128xi32>
    %c5_i32 = arith.constant 5 : i32
    %209 = vector.broadcast %c5_i32 : i32 to vector<8x128xi32>
    %210 = arith.cmpi eq, %159, %209 : vector<8x128xi32>
    %211 = arith.andi %208, %210 : vector<8x128xi1>
    %cst_59 = arith.constant 0.000000e+00 : f32
    %212 = vector.broadcast %143 : f32 to vector<8x128xf32>
    %213 = vector.broadcast %cst_59 : f32 to vector<8x128xf32>
    %214 = arith.select %211, %212, %213 : vector<8x128xi1>, vector<8x128xf32>
    %215 = arith.addf %206, %214 : vector<8x128xf32>
    %c0_i32_60 = arith.constant 0 : i32
    %216 = vector.broadcast %c0_i32_60 : i32 to vector<8x128xi32>
    %217 = arith.cmpi eq, %160, %216 : vector<8x128xi32>
    %c6_i32 = arith.constant 6 : i32
    %218 = vector.broadcast %c6_i32 : i32 to vector<8x128xi32>
    %219 = arith.cmpi eq, %159, %218 : vector<8x128xi32>
    %220 = arith.andi %217, %219 : vector<8x128xi1>
    %cst_61 = arith.constant 0.000000e+00 : f32
    %221 = vector.broadcast %158 : f32 to vector<8x128xf32>
    %222 = vector.broadcast %cst_61 : f32 to vector<8x128xf32>
    %223 = arith.select %220, %221, %222 : vector<8x128xi1>, vector<8x128xf32>
    %224 = arith.addf %215, %223 : vector<8x128xf32>
    %c0_62 = arith.constant 0 : index
    %c0_63 = arith.constant 0 : index
    %225 = vector.load %arg6[%c0_62, %c0_63] : memref<8x128xf32, #tpu.memory_space<vmem>>, vector<8x128xf32>
    tpu.vector_store %arg6[%c0_62, %c0_63], %224 {strides = array<i32>} : memref<8x128xf32, #tpu.memory_space<vmem>>, vector<8x128xf32>,
    return
  }
  func.func @transform_0(%arg0: i32) -> (i32, i32) {
    %c0_i32 = arith.constant 0 : i32
    %c0_i32_0 = arith.constant 0 : i32
    return %arg0, %c0_i32 : i32, i32
  }
  func.func @transform_1(%arg0: i32) -> (i32, i32) {
    %c0_i32 = arith.constant 0 : i32
    %c0_i32_0 = arith.constant 0 : i32
    %c0_i32_1 = arith.constant 0 : i32
    return %c0_i32, %c0_i32_0 : i32, i32
  }
  func.func @transform_2(%arg0: i32) -> (i32, i32) {
    %c0_i32 = arith.constant 0 : i32
    %c0_i32_0 = arith.constant 0 : i32
    %c0_i32_1 = arith.constant 0 : i32
    return %c0_i32, %c0_i32_0 : i32, i32
  }
  func.func @transform_3(%arg0: i32) -> (i32, i32) {
    %c0_i32 = arith.constant 0 : i32
    %c0_i32_0 = arith.constant 0 : i32
    %c0_i32_1 = arith.constant 0 : i32
    return %c0_i32, %c0_i32_0 : i32, i32
  }
  func.func @transform_4(%arg0: i32) -> (i32, i32) {
    %c0_i32 = arith.constant 0 : i32
    %c0_i32_0 = arith.constant 0 : i32
    %c0_i32_1 = arith.constant 0 : i32
    return %c0_i32, %c0_i32_0 : i32, i32
  }
  func.func @transform_5(%arg0: i32) -> (i32, i32) {
    %c0_i32 = arith.constant 0 : i32
    %c0_i32_0 = arith.constant 0 : i32
    return %arg0, %c0_i32 : i32, i32
  }
}

</mosaic_0001>

<bundles_post_ra>
// kernel: dice_forward.1
= control target key start
LH: loop header
LB: loop body
LE: loop exit
PB: predicated region body
PF: predicated region fallthrough
CT: control target
= control target key end

     0   :  { %s972_s18 = smov 0   ;;  %s1183_s0 = inlined_call_operand.vmem [shape: s32[16,4], index: 0, kind: input, shape index: {}]   ;;  %s1184_s1 = inlined_call_operand.vmem [shape: f32[56,64], index: 1, kind: input, shape index: {}]   ;;  %s1185_s2 = inlined_call_operand.vmem [shape: f32[80,64], index: 2, kind: input, shape index: {}]   ;;  %s1186_s3 = inlined_call_operand.vmem [shape: f32[64,64], index: 3, kind: input, shape index: {}]   ;;  %s1187_s4 = inlined_call_operand.vmem [shape: f32[8,64], index: 4, kind: input, shape index: {}]   ;;  %s1188_s5 = inlined_call_operand.vmem [shape: f32[16,128], index: 5, kind: output, shape index: {}]  }
   0x1 LB: > { %s978_s19 = sadd.s32 4294967295, %s933_s18   ;;  %p770_p0 = scmp.ge.s32.totalorder %s933_s18, 1  ;;  %s933_s18 = sphi %s972_s18, %s15_s18  }
   0x2   : > { %p186_p1 = scmp.lt.s32.totalorder %s933_s18, 3 }
   0x4   : > { %p187_p2 = pnand %p770_p0, %p186_p1 }
   0x5   : > { %p212_p3 = scmp.lt.s32.totalorder (!%p187_p2), %s978_s19, 1  ;;  %s940_s8 = smov (!%p187_p2), 96  }
   0x6   : > { %190 = sbr.rel (%p187_p2) target bundleno = 997 (0x3e5), region = 40  ;;  %s778_s9 = sshll.u32 (!%p187_p2), %s978_s19, 3 }
   0xb   : > { %v236_v0 = vld [vmem:[%s1184_s1 + $0x30] sm:$0xff]  ;;  %v935_v1 = vmov 0   ;;  %v936_v2 = vmov 2   ;;  %v333_v3 = vld [vmem:[%s1185_s2 + $0x48] sm:$0xff]  ;;  %s990_s24 = scalar_select %p212_p3, %s978_s19, 1  ;;  %v937_v4 = vmov 0.0   ;;  %v222_v22 = vlaneseq }
   0xc   : > { %899 = vset.pattern.permute.xlu0 %v935_v1  ;;  %901 = vset.pattern.permute.xlu1 %v936_v2  ;;  %v235_v5 = vld [vmem:[%s1184_s1 + $0x28] sm:$0xff]  ;;  %v332_v6 = vld [vmem:[%s1185_s2 + $0x40] sm:$0xff]  ;;  %v331_v8 = vld [vmem:[%s1185_s2 + $0x38] sm:$0xff]  ;;  %v938_v13 = vmov 1   ;;  %vm939_vm0 = vmmov 0   ;;  %vm237_vm1 = vcmask 457728   ;;  %v423_v58 = vstv %s778_s9 }
   0xd   : > { %811 = vmatprep.subr.mxu0 %v937_v4  ;;  %828 = vmatprep.subr.mxu1 %v937_v4  ;;  %s771_s29 = sshll.u32 %s990_s24, 3  ;;  %v234_v7 = vld [vmem:[%s1184_s1 + $0x20] sm:$0xff]  ;;  %v233_v10 = vld [vmem:[%s1184_s1 + $0x18] sm:$0xff]  ;;  %v330_v11 = vld [vmem:[%s1185_s2 + $0x30] sm:$0xff]  ;;  %v1071_v23 = vand.u32 127, %v222_v22  ;;  %vm334_vm5 = vcmask 654336  }
   0xe   : > { %812 = vmatpush3.msra.mxu0 %v236_v0  ;;  %829 = vmatpush3.msra.mxu1 %v333_v3  ;;  %s215_s7 = scalar_lea.vmem %s1183_s0, %s771_s29  ;;  %v232_v12 = vld [vmem:[%s1184_s1 + $0x10] sm:$0xff]  ;;  %v329_v14 = vld [vmem:[%s1185_s2 + $0x28] sm:$0xff]  ;;  %v328_v16 = vld [vmem:[%s1185_s2 + $0x20] sm:$0xff]  ;;  %vm529_vm6 = vcmask 523264   ;;  %vm409_vm7 = vcmask 261120   ;;  %v1124_v57 = vshrl.u32 %v222_v22, 7  ;;  %s219_s23 = scalar_lea.vmem %s1188_s5, %s771_s29 }
   0xf   : > { %813 = vmatprep.subr.mxu0 %v937_v4  ;;  %830 = vmatprep.subr.mxu1 %v937_v4  ;;  %v1014_v9 = vld [vmem:[%s215_s7] sm:$0xff]  ;;  %v231_v15 = vld [vmem:[%s1184_s1 + $0x8] sm:$0xff]  ;;  %v327_v18 = vld [vmem:[%s1185_s2 + $0x18] sm:$0xff]  ;;  %s941_s19 = smov 125   ;;  %vm447_vm12 = vcmask 7168   ;;  %vm538_vm13 = vcmask 253952  }
  0x10   : > { %814 = vmatpush3.msra.mxu0 %v235_v5  ;;  %831 = vmatpush3.msra.mxu1 %v332_v6  ;;  %v230_v17 = vld [vmem:[%s1184_s1] sm:$0xff]  ;;  %v326_v19 = vld [vmem:[%s1185_s2 + $0x10] sm:$0xff]  ;;  %v325_v20 = vld [vmem:[%s1185_s2 + $0x8] sm:$0xff]  ;;  %v424_v59 = vadd.s32 %v423_v58, %v1124_v57  ;;  %v221_v1 = vcvt.s32.f32 %v1014_v9  ;;  %vm682_vm15 = vcmp.eq.s32.totalorder %v1071_v23, 1 }
  0x11   : > { %815 = vmatprep.subr.mxu0 %v937_v4  ;;  %832 = vmatprep.subr.mxu1 %v937_v4  ;;  %v324_v21 = vld [vmem:[%s1185_s2] sm:$0xff]  ;;  %v570_v26 = vld [vmem:[%s1186_s3 + $0x38] sm:$0xff]  ;;  %v569_v28 = vld [vmem:[%s1186_s3 + $0x30] sm:$0xff] }
  0x12   : > { %225 = vperm.xlu0 %899, %v1014_v9   ;;  %318 = vperm.xlu1 %901, %v1014_v9   ;;  %v568_v31 = vld [vmem:[%s1186_s3 + $0x28] sm:$0xff]  ;;  %v567_v33 = vld [vmem:[%s1186_s3 + $0x20] sm:$0xff]  ;;  %v566_v35 = vld [vmem:[%s1186_s3 + $0x18] sm:$0xff]  ;;  %vm425_vm9 = vcmp.lt.s32.totalorder %v424_v59, 16 }
  0x13   : > { %816 = vmatpush3.msra.mxu0 %v234_v7  ;;  %833 = vmatpush3.msra.mxu1 %v331_v8  ;;  %v565_v36 = vld [vmem:[%s1186_s3 + $0x10] sm:$0xff]  ;;  %v564_v37 = vld [vmem:[%s1186_s3 + $0x8] sm:$0xff]  ;;  %v563_v38 = vld [vmem:[%s1186_s3] sm:$0xff]  ;;  %v1131_v3 = vsel %vm425_vm9, 1.0, %v937_v4  ;;  %vm702_vm9 = vcmp.eq.s32.totalorder %v1071_v23, 5 }
  0x14   : > { %817 = vmatprep.subr.mxu0 %v937_v4  ;;  %834 = vmatprep.subr.mxu1 %v937_v4  ;;  %v428_v6 = vmul.f32 %v1131_v3, %v221_v1 }
  0x15   : > { %818 = vmatpush3.msra.mxu0 %v233_v10  ;;  %835 = vmatpush3.msra.mxu1 %v330_v11 }
  0x16   : > { %900 = vset.pattern.permute.xlu0 %v938_v13  ;;  %819 = vmatprep.subr.mxu0 %v937_v4 }
  0x17   : > { %312 = vperm.xlu0 %900, %v1014_v9   ;;  %820 = vmatpush3.msra.mxu0 %v232_v12 }
  0x18   : > { %836 = vmatprep.subr.mxu1 %v937_v4  ;;  %821 = vmatprep.subr.mxu0 %v937_v4 }
  0x19   : > { %837 = vmatpush3.msra.mxu1 %v329_v14  ;;  %822 = vmatpush3.msra.mxu0 %v231_v15 }
  0x1a   : > { %838 = vmatprep.subr.mxu1 %v937_v4  ;;  %823 = vmatprep.subr.mxu0 %v937_v4 }
  0x1b   : > { %839 = vmatpush3.msra.mxu1 %v328_v16  ;;  %824 = vmatpush3.msra.mxu0 %v230_v17 }
  0x1c   : > { %825 = vmatprep.mubr.msk.f32.mxu0 %vm939_vm0, %v937_v4  ;;  %840 = vmatprep.subr.mxu1 %v937_v4 }
  0x1d   : > { %841 = vmatpush3.msra.mxu1 %v327_v18  ;;  %848 = vmatprep.mubr.msk.f32.mxu1 %vm939_vm0, %v937_v4 }
  0x1e   : > { %842 = vmatprep.subr.mxu1 %v937_v4  ;;  %851 = vmatprep.subr.mxu0 %v937_v4 }
  0x1f   : > { %843 = vmatpush3.msra.mxu1 %v326_v19  ;;  %902 = vset.pattern.permute.xlu0 %v936_v2 }
  0x20   : > { %844 = vmatprep.subr.mxu1 %v937_v4 }
  0x21   : > { %845 = vmatpush3.msra.mxu1 %v325_v20 }
  0x22   : > { %846 = vmatprep.subr.mxu1 %v937_v4 }
  0x23   : > { %847 = vmatpush3.msra.mxu1 %v324_v21 }
  0x8d   : > { %v226_v24 = vpop.permute.xlu0 %225  ;;  %v319_v25 = vpop.permute.xlu1 %318 }
  0x8e   : > { %vm227_vm2 = vcmp.eq.s32.totalorder %v1071_v23, %v226_v24  ;;  %vm320_vm3 = vcmp.eq.s32.totalorder %v1071_v23, %v319_v25 }
  0x8f   : > { %v773_v27 = vsel %vm227_vm2, 1.0, %v937_v4  ;;  %v776_v29 = vsel %vm320_vm3, 1.0, %v937_v4  ;;  %vm687_vm3 = vcmp.eq.s32.totalorder %v1071_v23, 2 }
  0x90   : > { %826 = vmatmul.mubr.msk.f32.vlgmr.msra.gmra.mxu0 %vm237_vm1, %v773_v27  ;;  %vm677_vm1 = vcmp.eq.s32.totalorder %v1071_v23, 0 }
  0x91   : > { %852 = vmatpush3.msra.mxu0 %v570_v26  ;;  %867 = vmatprep.mubr.msk.f32.mxu0 %vm939_vm0, %v937_v4  ;;  %vm676_vm0 = vcmp.eq.s32.totalorder %v1124_v57, 0 }
  0x92   : > { %v313_v30 = vpop.permute.xlu0 %312  ;;  %853 = vmatprep.subr.mxu0 %v937_v4  ;;  %vm683_vm2 = vmand %vm676_vm0, %vm682_vm15 }
  0x93   : > { %vm314_vm4 = vcmp.eq.s32.totalorder %v1071_v23, %v313_v30  ;;  %854 = vmatpush3.msra.mxu0 %v569_v28 }
  0x94   : > { %v775_v32 = vsel %vm314_vm4, 1.0, %v937_v4  ;;  %855 = vmatprep.subr.mxu0 %v937_v4  ;;  %vm678_vm4 = vmand %vm676_vm0, %vm677_vm1 }
  0x95   : > { %v323_v34 = vsub.f32 %v775_v32, %v776_v29  ;;  %856 = vmatpush3.msra.mxu0 %v568_v31 }
  0x96   : > { %857 = vmatprep.subr.mxu0 %v937_v4 }
  0x97   : > { %849 = vmatmul.mubr.msk.f32.vlgmr.msra.gmra.mxu1 %vm334_vm5, %v323_v34  ;;  %858 = vmatpush3.msra.mxu0 %v567_v33  ;;  %vm692_vm5 = vcmp.eq.s32.totalorder %v1071_v23, 3 }
  0x98   : > { %859 = vmatprep.subr.mxu0 %v937_v4 }
  0x99   : > { %860 = vmatpush3.msra.mxu0 %v566_v35 }
  0x9a   : > { %861 = vmatprep.subr.mxu0 %v937_v4 }
  0x9b   : > { %862 = vmatpush3.msra.mxu0 %v565_v36 }
  0x9c   : > { %863 = vmatprep.subr.mxu0 %v937_v4 }
  0x9d   : > { %864 = vmatpush3.msra.mxu0 %v564_v37 }
  0x9e   : > { %865 = vmatprep.subr.mxu0 %v937_v4 }
  0x9f   : > { %866 = vmatpush3.msra.mxu0 %v563_v38 }
 0x150   : > { %v1112_v39 = vpop.f32.mrf.mxu0 }
 0x151   : > { %868 = vmatmul.mubr.msk.f32.vlgmr.msra.gmra.mxu0 %vm529_vm6, %v1112_v39  ;;  %v530_v28 = vsel %vm529_vm6, %v1112_v39, 0.0 }
 0x152   : > { %v827_v40 = vpop.f32.mrf.mxu0  ;;  %v531_v33 = vrot.slane %v530_v28, 4 }
 0x153   : > { %v473_v40 = vsub.f32 %v1131_v3, %v428_v6 }
 0x154   : > { %v532_v35 = vadd.f32 %v531_v33, %v530_v28 }
 0x156   : > { %v533_v36 = vrot.slane %v532_v35, 2 }
 0x157   : > { %v404_v41 = vpop.f32.mrf.mxu1 }
 0x158   : > { %v408_v42 = vmul.f32 %v404_v41, %v1112_v39  ;;  %v534_v37 = vadd.f32 %v533_v36, %v532_v35 }
 0x159   : > { %v850_v43 = vpop.f32.mrf.mxu1 }
 0x15a   : > { %414 = vrot.lane.b32.xlu1 %v408_v42, %s940_s8  ;;  %v410_v44 = vsel %vm409_vm7, %v408_v42, 0.0 }
 0x15b   : > { %411 = vadd.xlane.f32.xlu0 %v410_v44  ;;  %v535_v44 = vrot.slane %v534_v37, 1 }
 0x1cc   : > { %v415_v45 = vpop.permute.xlu1 %414 }
 0x1cd   : > { %v417_v46 = vsel %vm409_vm7, %v415_v45, 0.0  ;;  %vm693_vm7 = vmand %vm676_vm0, %vm692_vm5 }
 0x1ce   : > { %418 = vadd.xlane.f32.xlu1 %v417_v46 }
 0x1e4   : > { %v1118_v47 = vpop.xlane.xlu0 %411 }
 0x1e5   : > { %v429_v48 = vand.u32 2147483647, %v1118_v47  ;;  %vm433_vm8 = vcmp.ge.f32.partialorder %v1118_v47, 0.0 }
 0x1e7   : > { %v430_v49 = vsub.f32 0.0, %v429_v48  ;;  %v536_v48 = vadd.f32 %v535_v44, %v534_v37 }
 0x1e9   : > { %v431_v50 = vmul.f32 1.442695, %v430_v49  ;;  %v528_v49 = vld [vmem:[%s1187_s4] sm:$0x1] }
 0x1eb   : > { %903 = vpow2.f32 %v431_v50  ;;  %v537_v50 = vmul.f32 %v536_v48, %v528_v49 }
 0x1f8   : > { %v904_v51 = vpop.eup %903 }
 0x1f9   : > { %v434_v52 = vadd.f32 1.0, %v904_v51 }
 0x1fb   : > { %905 = vrcp.f32 %v434_v52 }
 0x208   : > { %v906_v53 = vpop.eup %905 }
 0x209   : > { %v437_v54 = vmul.f32 %v906_v53, %v904_v51 }
 0x20b   : > { %v438_v55 = vsel %vm433_vm8, %v906_v53, %v437_v54  ;;  %vm697_vm8 = vcmp.eq.s32.totalorder %v1071_v23, 4 }
 0x20c   : > { %v439_v56 = vadd.f32 1e-10, %v438_v55 }
 0x20e   : > { %907 = vlog2.f32 %v439_v56  ;;  %v539_v56 = vsel %vm538_vm13, %v537_v50, 0.0 }
 0x211   : > { %v640_v60 = vpop.f32.mrf.mxu0 }
 0x212   : > { %v644_v61 = vmul.f32 %v640_v60, %v1112_v39 }
 0x213   : > { %v869_v62 = vpop.f32.mrf.mxu0 }
 0x214   : > { %v645_v63 = vsel %vm529_vm6, %v644_v61, 0.0  ;;  %vm688_vm6 = vmand %vm676_vm0, %vm687_vm3 }
 0x215   : > { %v646_v0 = vrot.slane %v645_v63, 4 }
 0x217   : > { %v647_v2 = vadd.f32 %v646_v0, %v645_v63 }
 0x219   : > { %v648_v5 = vrot.slane %v647_v2, 2 }
 0x21b   : > { %v908_v7 = vpop.eup %907  ;;  %v649_v8 = vadd.f32 %v648_v5, %v647_v2 }
 0x21c   : > { %v441_v10 = vmul.f32 0.6931472, %v908_v7 }
 0x21d   : > { %v650_v12 = vrot.slane %v649_v8, 1 }
 0x21e   : > { %v442_v11 = vmul.f32 %v441_v10, %v428_v6 }
 0x21f   : > { %v651_v13 = vadd.f32 %v650_v12, %v649_v8 }
 0x220   : > { %444 = vrot.lane.b32.xlu0 %v442_v11, %s941_s19 }
 0x221   : > { %v652_v59 = vsel %vm538_vm13, %v651_v13, 0.0 }
 0x224   : > { %663 = vrot.lane.b32.xlu0 %v651_v13, %s940_s8 }
 0x257   : > { %v419_v14 = vpop.xlane.xlu1 %418 }
 0x258   : > { %v458_v9 = vsub.f32 0.0, %v419_v14  ;;  %v474_v15 = vand.u32 2147483647, %v419_v14  ;;  %vm478_vm10 = vcmp.ge.f32.partialorder %v419_v14, 0.0  ;;  %v503_v51 = vadd.f32 %v419_v14, %v1118_v47 }
 0x25a   : > { %v459_v16 = vand.u32 2147483647, %v458_v9  ;;  %v475_v4 = vsub.f32 0.0, %v474_v15  ;;  %vm463_vm11 = vcmp.ge.f32.partialorder %v458_v9, 0.0  ;;  %v504_v52 = vand.u32 2147483647, %v503_v51 }
 0x25b   : > { %vm508_vm14 = vcmp.ge.f32.partialorder %v503_v51, 0.0 }
 0x25c   : > { %v460_v17 = vsub.f32 0.0, %v459_v16  ;;  %v476_v18 = vmul.f32 1.442695, %v475_v4  ;;  %v505_v55 = vsub.f32 0.0, %v504_v52 }
 0x25e   : > { %v461_v19 = vmul.f32 1.442695, %v460_v17  ;;  %909 = vpow2.f32 %v476_v18  ;;  %v506_v58 = vmul.f32 1.442695, %v505_v55 }
 0x260   : > { %911 = vpow2.f32 %v461_v19 }
 0x26b   : > { %v910_v20 = vpop.eup %909 }
 0x26c   : > { %v479_v21 = vadd.f32 1.0, %v910_v20 }
 0x26d   : > { %v912_v22 = vpop.eup %911 }
 0x26e   : > { %v464_v24 = vadd.f32 1.0, %v912_v22  ;;  %913 = vrcp.f32 %v479_v21 }
 0x270   : > { %915 = vrcp.f32 %v464_v24 }
 0x27b   : > { %v914_v25 = vpop.eup %913 }
 0x27c   : > { %v482_v26 = vmul.f32 %v914_v25, %v910_v20 }
 0x27d   : > { %v916_v27 = vpop.eup %915 }
 0x27e   : > { %v467_v29 = vmul.f32 %v916_v27, %v912_v22  ;;  %v483_v30 = vsel %vm478_vm10, %v914_v25, %v482_v26  ;;  %vm698_vm10 = vmand %vm676_vm0, %vm697_vm8 }
 0x27f   : > { %v484_v31 = vadd.f32 1e-10, %v483_v30 }
 0x280   : > { %v468_v32 = vsel %vm463_vm11, %v916_v27, %v467_v29  ;;  %vm707_vm11 = vcmp.eq.s32.totalorder %v1071_v23, 6 }
 0x281   : > { %v469_v34 = vadd.f32 1e-10, %v468_v32  ;;  %917 = vlog2.f32 %v484_v31 }
 0x283   : > { %919 = vlog2.f32 %v469_v34 }
 0x284   : > { %921 = vpow2.f32 %v506_v58 }
 0x28e   : > { %v918_v38 = vpop.eup %917 }
 0x28f   : > { %v486_v41 = vmul.f32 0.6931472, %v918_v38 }
 0x290   : > { %v920_v42 = vpop.eup %919 }
 0x291   : > { %v471_v43 = vmul.f32 0.6931472, %v920_v42  ;;  %v487_v45 = vmul.f32 %v486_v41, %v473_v40  ;;  %v922_v60 = vpop.eup %921 }
 0x292   : > { %v445_v53 = vpop.permute.xlu0 %444  ;;  %v509_v61 = vadd.f32 1.0, %v922_v60 }
 0x293   : > { %v472_v39 = vmul.f32 %v471_v43, %v428_v6  ;;  %v448_v54 = vsel %vm447_vm12, %v445_v53, 0.0 }
 0x294   : > { %923 = vrcp.f32 %v509_v61 }
 0x295   : > { %v488_v46 = vadd.f32 %v487_v45, %v472_v39 }
 0x296   : > { %v664_v12 = vpop.permute.xlu0 %663 }
 0x297   : > { %490 = vrot.lane.b32.xlu1 %v488_v46, %s941_s19  ;;  %v666_v13 = vsel %vm538_vm13, %v664_v12, 0.0 }
 0x29b   : > { %550 = vrot.lane.b32.xlu1 %v537_v50, %s940_s8 }
 0x2a1   : > { %v924_v47 = vpop.eup %923 }
 0x2a2   : > { %v512_v62 = vmul.f32 %v924_v47, %v922_v60 }
 0x2a4   : > { %v513_v63 = vsel %vm508_vm14, %v924_v47, %v512_v62 }
 0x2a5   : > { %v514_v0 = vadd.f32 1e-10, %v513_v63 }
 0x2a7   : > { %925 = vlog2.f32 %v514_v0 }
 0x2b4   : > { %v926_v1 = vpop.eup %925 }
 0x2b5   : > { %v516_v2 = vmul.f32 0.6931472, %v926_v1 }
 0x2b7   : > { %v517_v7 = vmul.f32 %v1131_v3, %v516_v2 }
 0x2b9   : > { %v518_v8 = vsel %vm447_vm12, %v517_v7, 0.0 }
 0x2bf   : > { %449 = vadd.xlane.f32.xlu1 %v448_v54 }
 0x2c3   : > { %540 = vadd.xlane.f32.xlu1 %v539_v56 }
 0x2c7   : > { %653 = vadd.xlane.f32.xlu1 %v652_v59 }
 0x309   : > { %v491_v5 = vpop.permute.xlu1 %490 }
 0x30a   : > { %v493_v6 = vsel %vm447_vm12, %v491_v5, 0.0  ;;  %vm703_vm12 = vmand %vm676_vm0, %vm702_vm9 }
 0x30b   : > { %494 = vadd.xlane.f32.xlu0 %v493_v6 }
 0x30d   : > { %v551_v10 = vpop.permute.xlu1 %550 }
 0x30e   : > { %v553_v11 = vsel %vm538_vm13, %v551_v10, 0.0  ;;  %vm708_vm13 = vmand %vm676_vm0, %vm707_vm11 }
 0x30f   : > { %519 = vadd.xlane.f32.xlu0 %v518_v8 }
 0x313   : > { %554 = vadd.xlane.f32.xlu0 %v553_v11 }
 0x317   : > { %667 = vadd.xlane.f32.xlu0 %v666_v13 }
 0x348   : > { %v450_v14 = vpop.xlane.xlu1 %449 }
 0x349   : > { %v451_v9 = vrot.slane %v450_v14, 4 }
 0x34b   : > { %v452_v15 = vadd.f32 %v451_v9, %v450_v14 }
 0x34c   : > { %v541_v3 = vpop.xlane.xlu1 %540 }
 0x34d   : > { %v453_v16 = vrot.slane %v452_v15, 2  ;;  %v542_v19 = vrot.slane %v541_v3, 4 }
 0x34f   : > { %v454_v4 = vadd.f32 %v453_v16, %v452_v15  ;;  %v543_v21 = vadd.f32 %v542_v19, %v541_v3 }
 0x350   : > { %v654_v20 = vpop.xlane.xlu1 %653 }
 0x351   : > { %v455_v17 = vrot.slane %v454_v4, 1  ;;  %v655_v22 = vrot.slane %v654_v20, 4  ;;  %v544_v27 = vrot.slane %v543_v21, 2 }
 0x353   : > { %v456_v18 = vadd.f32 %v455_v17, %v454_v4  ;;  %v656_v28 = vadd.f32 %v655_v22, %v654_v20  ;;  %v545_v36 = vadd.f32 %v544_v27, %v543_v21 }
 0x355   : > { %870 = vpush %v456_v18  ;;  %v657_v34 = vrot.slane %v656_v28, 2  ;;  %v546_v45 = vrot.slane %v545_v36, 1 }
 0x357   : > { %v658_v44 = vadd.f32 %v657_v34, %v656_v28  ;;  %v547_v53 = vadd.f32 %v546_v45, %v545_v36 }
 0x359   : > { %v659_v54 = vrot.slane %v658_v44, 1 }
 0x35b   : > { %v660_v60 = vadd.f32 %v659_v54, %v658_v44 }
 0x386   : > { %s871_s12 = spop %870 }
 0x387   : > { %v679_v62 = vstv %s871_s12 }
 0x388   : > { %v680_v1 = vsel %vm678_vm4, %v679_v62, 0.0 }
 0x394   : > { %v495_v24 = vpop.xlane.xlu0 %494 }
 0x395   : > { %v496_v25 = vrot.slane %v495_v24, 4 }
 0x397   : > { %v497_v26 = vadd.f32 %v496_v25, %v495_v24 }
 0x398   : > { %v520_v29 = vpop.xlane.xlu0 %519 }
 0x399   : > { %v498_v30 = vrot.slane %v497_v26, 2  ;;  %v521_v31 = vrot.slane %v520_v29, 4 }
 0x39b   : > { %v522_v32 = vadd.f32 %v521_v31, %v520_v29  ;;  %v499_v33 = vadd.f32 %v498_v30, %v497_v26 }
 0x39c   : > { %v555_v35 = vpop.xlane.xlu0 %554 }
 0x39d   : > { %v523_v37 = vrot.slane %v522_v32, 2  ;;  %v556_v38 = vrot.slane %v555_v35, 4  ;;  %v500_v40 = vrot.slane %v499_v33, 1 }
 0x39f   : > { %v557_v41 = vadd.f32 %v556_v38, %v555_v35  ;;  %v501_v42 = vadd.f32 %v500_v40, %v499_v33  ;;  %v524_v43 = vadd.f32 %v523_v37, %v522_v32 }
 0x3a0   : > { %v668_v39 = vpop.xlane.xlu0 %667 }
 0x3a1   : > { %v558_v46 = vrot.slane %v557_v41, 2  ;;  %v669_v48 = vrot.slane %v668_v39, 4  ;;  %872 = vpush %v501_v42  ;;  %v525_v49 = vrot.slane %v524_v43, 1 }
 0x3a3   : > { %v670_v50 = vadd.f32 %v669_v48, %v668_v39  ;;  %v526_v51 = vadd.f32 %v525_v49, %v524_v43  ;;  %v559_v52 = vadd.f32 %v558_v46, %v557_v41 }
 0x3a5   : > { %v671_v55 = vrot.slane %v670_v50, 2  ;;  %874 = vpush %v526_v51  ;;  %v560_v56 = vrot.slane %v559_v52, 1 }
 0x3a6   : > { %876 = vpush %v547_v53 }
 0x3a7   : > { %v672_v58 = vadd.f32 %v671_v55, %v670_v50  ;;  %v561_v59 = vadd.f32 %v560_v56, %v559_v52 }
 0x3a9   : > { %878 = vpush %v561_v59  ;;  %v673_v61 = vrot.slane %v672_v58, 1 }
 0x3aa   : > { %880 = vpush %v660_v60 }
 0x3ab   : > { %v674_v47 = vadd.f32 %v673_v61, %v672_v58 }
 0x3ad   : > { %882 = vpush %v674_v47 }
 0x3d2   : > { %s873_s13 = spop %872 }
 0x3d3   : > { %v684_v63 = vstv %s873_s13 }
 0x3d4   : > { %v685_v0 = vsel %vm683_vm2, %v684_v63, 0.0 }
 0x3d5   : > { %v686_v2 = vadd.f32 %v685_v0, %v680_v1 }
 0x3d6   : > { %s875_s14 = spop %874 }
 0x3d7   : > { %v689_v5 = vstv %s875_s14  ;;  %s877_s15 = spop %876 }
 0x3d8   : > { %v690_v6 = vsel %vm688_vm6, %v689_v5, 0.0  ;;  %v694_v7 = vstv %s877_s15 }
 0x3d9   : > { %v691_v8 = vadd.f32 %v690_v6, %v686_v2  ;;  %v695_v10 = vsel %vm693_vm7, %v694_v7, 0.0 }
 0x3da   : > { %s879_s16 = spop %878 }
 0x3db   : > { %v696_v11 = vadd.f32 %v695_v10, %v691_v8  ;;  %s881_s17 = spop %880  ;;  %v704_v12 = vstv %s879_s16 }
 0x3dc   : > { %v699_v13 = vstv %s881_s17  ;;  %v705_v15 = vsel %vm703_vm12, %v704_v12, 0.0 }
 0x3dd   : > { %v700_v14 = vsel %vm698_vm10, %v699_v13, 0.0 }
 0x3de   : > { %v701_v9 = vadd.f32 %v700_v14, %v696_v11  ;;  %s883_s20 = spop %882 }
 0x3df   : > { %v709_v16 = vstv %s883_s20 }
 0x3e0   : > { %v706_v4 = vadd.f32 %v705_v15, %v701_v9  ;;  %v710_v17 = vsel %vm708_vm13, %v709_v16, 0.0 }
 0x3e2   : > { %v711_v23 = vadd.f32 %v710_v17, %v706_v4 }
 0x3e4   : > { %712 = vst [vmem:[%s219_s23] sm:$0xff] %v711_v23 }
 0x3e5 PF: > { %s15_s18 = sadd.s32 1, %s933_s18  }
 0x3e6   : > { %p12_p4 = scmp.ge.s32.totalorder %s15_s18, 4  }
 0x3e8   :  { %14 = sbr.rel (!%p12_p4) target bundleno = 1 (0x1), region = 70 }

</bundles_post_ra>
